<compile_context>
chip_gen: v5e
topology: v5e:2x2
jax: 0.10.0
libtpu: 0.0.40
codegen_flags: <defaults>
</compile_context>

<pallas_src>
import functools

import jax
import jax.numpy as jnp
from jax.experimental import pallas as pl
from jax.experimental.pallas import tpu as pltpu


def cluster_memory_kernel(inputs_ref,    # VMEM (B, F) f32   resident block
                          tgt_ref,       # VMEM (B, 1) i32   resident block (targets column)
                          features_ref,  # VMEM (S, tile_c) bf16  per-step bank slab
                          loss_ref,      # VMEM (1, 1) f32   resident output
                          x_sc,          # VMEM (B, F) bf16  normalized & 1/temp-scaled inputs
                          m_sc,          # VMEM (B, 1) f32   running max
                          l_sc,          # VMEM (B, 1) f32   running sum
                          t_sc,          # VMEM (B, 1) f32   accumulated target logit
                          *, inv_temp, batch, num_classes):
    j = pl.program_id(0)
    tile_c = features_ref.shape[1]

    @pl.when(j == 0)
    def _init():
        # F.normalize(inputs, dim=1) fused with the 1/temp logits scale:
        #   x / max(||x||, 1e-12) / temp == x * rsqrt(max(||x||^2, 1e-24)) * (1/temp)
        x = inputs_ref[...].astype(jnp.float32)
        sq = jnp.sum(x * x, axis=1, keepdims=True)
        scale = jax.lax.rsqrt(jnp.maximum(sq, 1e-24)) * inv_temp
        x_sc[...] = (x * scale).astype(x_sc.dtype)      # bf16 MXU operand

        m_sc[...] = jnp.full(m_sc.shape, -jnp.inf, jnp.float32)
        l_sc[...] = jnp.zeros(l_sc.shape, jnp.float32)
        t_sc[...] = jnp.zeros(t_sc.shape, jnp.float32)

    # Logits for this class tile: (B, tile_c). bf16 x bf16 -> f32 accumulate on the MXU.
    logits = jnp.dot(x_sc[...], features_ref[...],
                     preferred_element_type=jnp.float32)

    # Ragged-tile mask: columns beyond the real class count get -inf (and never "hit").
    col = jax.lax.broadcasted_iota(jnp.int32, (batch, tile_c), 1) + j * tile_c
    valid = col < num_classes
    logits = jnp.where(valid, logits, -jnp.inf)

    # Online softmax (flash-style) over the class axis — all in f32.
    m_prev = m_sc[...]
    m_new = jnp.maximum(m_prev, jnp.max(logits, axis=1, keepdims=True))
    alpha = jnp.exp(m_prev - m_new)
    p = jnp.exp(logits - m_new)
    l_sc[...] = alpha * l_sc[...] + jnp.sum(p, axis=1, keepdims=True)
    m_sc[...] = m_new

    # Target-logit extraction with a tile-local mask (no full (B, C) one-hot).
    hit = jnp.logical_and(valid, col == tgt_ref[...])
    t_sc[...] += jnp.sum(jnp.where(hit, logits, 0.0), axis=1, keepdims=True)

    @pl.when(j == pl.num_programs(0) - 1)
    def _finalize():
        # per-sample CE: logsumexp(logits) - logits[target]; mean over the batch.
        per_sample = m_sc[...] + jnp.log(l_sc[...]) - t_sc[...]
        loss_ref[...] = jnp.sum(per_sample, axis=0, keepdims=True) * (1.0 / batch)


def _derive_tiling(S, C, B, F, bank_bytes=2):
    """VMEM-bounded maximal class tile + per-generation VMEM limit."""
    try:
        vmem_phys = pltpu.get_tpu_info().vmem_capacity_bytes
    except Exception:
        vmem_phys = 64 * 1024 * 1024                 # conservative fallback (v7x per-TC VMEM)
    vmem_limit = (vmem_phys * 3) // 4                # ~96 MiB on v5e/v6e, ~48 MiB on v7x

    fixed = 2 * B * F * 4                            # resident f32 inputs (double-buffered)
    fixed += 2 * B * 4                               # (B,1) int32 targets column
    fixed += B * F * 2                               # bf16 x_sc scratch
    fixed += 3 * B * 4 + 2 * 4                       # m/l/tgt scratch + (1,1) loss block
    headroom = 4 * 1024 * 1024                       # layout padding / compiler temporaries

    budget = max(vmem_limit - fixed - headroom, 2 * S * bank_bytes * 128)
    tile_c = (budget // (2 * S * bank_bytes) // 128) * 128   # 2-deep double-buffered slabs
    tile_c = max(tile_c, 128)
    if C >= 128:
        tile_c = min(tile_c, (C // 128) * 128)       # last (ragged) tile handled in-kernel
    else:
        tile_c = C                                   # single full-width block
    return int(tile_c), int(vmem_limit)


def cluster_memory_loss(inputs, features, targets, temp=0.05, max_block_classes=None):
    """JAX wrapper reproducing ClusterMemory.forward (use_hard=False path)."""
    B, F = inputs.shape
    S, C = features.shape
    # inputs.mm(features) (no transpose) contracts inputs' feature dim with the bank's
    # row (sample) dim -> the PyTorch module implicitly requires num_features == num_samples.
    assert F == S, "CM.forward's inputs.mm(features) requires num_features == num_samples"

    tile_c, vmem_limit = _derive_tiling(S, C, B, F)
    if max_block_classes is not None:
        tile_c = min(tile_c, max(128, (int(max_block_classes) // 128) * 128))
    grid_c = pl.cdiv(C, tile_c)

    features_bf16 = features.astype(jnp.bfloat16)            # halve the dominant HBM stream
    targets_col = targets.reshape(B, 1).astype(jnp.int32)

    kernel = functools.partial(cluster_memory_kernel,
                               inv_temp=1.0 / float(temp), batch=B, num_classes=C)

    grid_spec = pltpu.PrefetchScalarGridSpec(
        num_scalar_prefetch=0,
        grid=(grid_c,),                                       # softmax/class axis (reduction)
        in_specs=[
            # Constant block index -> inputs stay resident in VMEM across the grid.
            pl.BlockSpec((B, F), lambda j: (0, 0)),
            # Targets as a tiny resident (B, 1) int32 column (no unrolled splat).
            pl.BlockSpec((B, 1), lambda j: (0, 0)),
            # One (S, tile_c) bf16 slab of the memory bank per step; its DMA overlaps the
            # MXU matmul of the previous slab via BlockSpec double-buffering.
            pl.BlockSpec((S, tile_c), lambda j: (0, j)),
        ],
        out_specs=pl.BlockSpec((1, 1), lambda j: (0, 0)),
        scratch_shapes=[
            pltpu.VMEM((B, F), jnp.bfloat16),   # normalized & 1/temp-scaled inputs (MXU LHS)
            pltpu.VMEM((B, 1), jnp.float32),    # running max  m
            pltpu.VMEM((B, 1), jnp.float32),    # running sum  l
            pltpu.VMEM((B, 1), jnp.float32),    # accumulated target logit
        ],
    )

    loss = pl.pallas_call(
        kernel,
        out_shape=jax.ShapeDtypeStruct((1, 1), jnp.float32),
        grid_spec=grid_spec,
        compiler_params=pltpu.CompilerParams(
            dimension_semantics=("arbitrary",),   # class axis is the softmax reduction
            vmem_limit_bytes=vmem_limit,          # per-generation budget (3/4 of physical)
        ),
    )(inputs, targets_col, features_bf16)
    return loss[0, 0]


def reference_loss(inputs, features, targets, temp):
    """Pure-JAX f32 reference mirroring the PyTorch forward."""
    x = inputs / jnp.maximum(jnp.linalg.norm(inputs, axis=1, keepdims=True), 1e-12)
    logits = jnp.dot(x, features, precision=jax.lax.Precision.HIGHEST) / temp
    logp = jax.nn.log_softmax(logits, axis=1)
    return -jnp.mean(logp[jnp.arange(x.shape[0]), targets])


if __name__ == "__main__":
    # Small but hardware-aligned shapes: B multiple of 8 (f32 sublanes); N = 320 is NOT a
    # multiple of the class tile, so both calls exercise the ragged-last-tile masking.
    B = 8
    N = 320            # num_features == num_samples == number of classes (see note above)
    TEMP = 0.05

    key = jax.random.PRNGKey(0)
    k_in, k_feat, k_tgt = jax.random.split(key, 3)

    inputs = jax.random.normal(k_in, (B, N), dtype=jnp.float32)

    # Deterministic synthetic memory bank (row-normalized cluster prototypes); the real
    # module initializes `features` to zeros and fills it during training.
    features = jax.random.normal(k_feat, (N, N), dtype=jnp.float32)
    features = features / jnp.maximum(
        jnp.linalg.norm(features, axis=1, keepdims=True), 1e-12)

    targets = jax.random.randint(k_tgt, (B,), 0, N, dtype=jnp.int32)

    ref = jax.block_until_ready(reference_loss(inputs, features, targets, TEMP))

    # 1) VMEM-bounded (auto) class tile: tile_c = 256 -> grid of 2 with a ragged last tile.
    loss_auto = jax.block_until_ready(
        cluster_memory_loss(inputs, features, targets, temp=TEMP))
    # 2) Forced narrow tile: exercises a longer multi-step online-softmax reduction.
    loss_small = jax.block_until_ready(
        cluster_memory_loss(inputs, features, targets, temp=TEMP, max_block_classes=128))

    # bf16 bank/operands -> loosened tolerance vs. the f32 HIGHEST reference.
    assert jnp.allclose(loss_auto, ref, rtol=2e-2, atol=5e-2), (loss_auto, ref)
    assert jnp.allclose(loss_small, ref, rtol=2e-2, atol=5e-2), (loss_small, ref)
    # Different class tilings must agree with each other to f32 accumulation noise.
    assert jnp.allclose(loss_auto, loss_small, rtol=1e-4, atol=1e-4), (loss_auto, loss_small)

    print("KERNEL_OK")
</pallas_src>

<mosaic_0001>
module attributes {stable_mosaic.version = 11 : i64} {
  func.func @cluster_memory_kernel(%arg0: i32, %arg1: memref<8x320xf32, #tpu.memory_space<vmem>>, %arg2: memref<8x1xi32, #tpu.memory_space<vmem>>, %arg3: memref<320x256xbf16, #tpu.memory_space<vmem>>, %arg4: memref<1x1xf32, #tpu.memory_space<vmem>>, %arg5: memref<8x320xbf16, #tpu.memory_space<vmem>>, %arg6: memref<8x1xf32, #tpu.memory_space<vmem>>, %arg7: memref<8x1xf32, #tpu.memory_space<vmem>>, %arg8: memref<8x1xf32, #tpu.memory_space<vmem>>) attributes {dimension_semantics = [#tpu.dimension_semantics<arbitrary>], iteration_bounds = array<i64: 2>, scalar_prefetch = 0 : i64, scratch_operands = 4 : i64, tpu.core_type = #tpu.core_type<tc>, window_params = [{pipeline_mode = #tpu.pipeline_mode<synchronous>, transform_indices = @transform_0, window_bounds = array<i64: 8, 320>}, {pipeline_mode = #tpu.pipeline_mode<synchronous>, transform_indices = @transform_1, window_bounds = array<i64: 8, 1>}, {transform_indices = @transform_2, window_bounds = array<i64: 320, 256>}, {pipeline_mode = #tpu.pipeline_mode<synchronous>, transform_indices = @transform_3, window_bounds = array<i64: 1, 1>}]} {
    %c0_i32 = arith.constant 0 : i32
    %0 = arith.cmpi eq, %arg0, %c0_i32 : i32
    %1 = arith.extui %0 : i1 to i32
    %c0_i32_0 = arith.constant 0 : i32
    %2 = arith.cmpi ne, %1, %c0_i32_0 : i32
    scf.if %2 {
      %c0_24 = arith.constant 0 : index
      %c0_25 = arith.constant 0 : index
      %44 = vector.load %arg1[%c0_24, %c0_25] : memref<8x320xf32, #tpu.memory_space<vmem>>, vector<8x320xf32>
      %45 = arith.mulf %44, %44 : vector<8x320xf32>
      %cst_26 = arith.constant dense<0.000000e+00> : vector<8xf32>
      %46 = vector.multi_reduction <add>, %45, %cst_26 [1] : vector<8x320xf32> to vector<8xf32>
      %47 = vector.shape_cast %46 : vector<8xf32> to vector<8x1xf32>
      %cst_27 = arith.constant 1.000000e-24 : f32
      %48 = vector.broadcast %cst_27 : f32 to vector<8x1xf32>
      %49 = arith.maximumf %47, %48 : vector<8x1xf32>
      %50 = math.rsqrt %49 : vector<8x1xf32>
      %cst_28 = arith.constant 2.000000e+01 : f32
      %51 = vector.broadcast %cst_28 : f32 to vector<8x1xf32>
      %52 = arith.mulf %50, %51 : vector<8x1xf32>
      %53 = vector.broadcast %52 : vector<8x1xf32> to vector<8x320xf32>
      %54 = arith.mulf %44, %53 : vector<8x320xf32>
      %55 = arith.truncf %54 : vector<8x320xf32> to vector<8x320xbf16>
      %c0_29 = arith.constant 0 : index
      %c0_30 = arith.constant 0 : index
      %56 = vector.load %arg5[%c0_29, %c0_30] : memref<8x320xbf16, #tpu.memory_space<vmem>>, vector<8x320xbf16>
      tpu.vector_store %arg5[%c0_29, %c0_30], %55 {strides = array<i32>} : memref<8x320xbf16, #tpu.memory_space<vmem>>, vector<8x320xbf16>,
      %cst_31 = arith.constant 0xFF800000 : f32
      %57 = vector.broadcast %cst_31 : f32 to vector<8x1xf32>
      %c0_32 = arith.constant 0 : index
      %c0_33 = arith.constant 0 : index
      %58 = vector.load %arg6[%c0_32, %c0_33] : memref<8x1xf32, #tpu.memory_space<vmem>>, vector<8x1xf32>
      tpu.vector_store %arg6[%c0_32, %c0_33], %57 {strides = array<i32>} : memref<8x1xf32, #tpu.memory_space<vmem>>, vector<8x1xf32>,
      %cst_34 = arith.constant 0.000000e+00 : f32
      %59 = vector.broadcast %cst_34 : f32 to vector<8x1xf32>
      %c0_35 = arith.constant 0 : index
      %c0_36 = arith.constant 0 : index
      %60 = vector.load %arg7[%c0_35, %c0_36] : memref<8x1xf32, #tpu.memory_space<vmem>>, vector<8x1xf32>
      tpu.vector_store %arg7[%c0_35, %c0_36], %59 {strides = array<i32>} : memref<8x1xf32, #tpu.memory_space<vmem>>, vector<8x1xf32>,
      %cst_37 = arith.constant 0.000000e+00 : f32
      %61 = vector.broadcast %cst_37 : f32 to vector<8x1xf32>
      %c0_38 = arith.constant 0 : index
      %c0_39 = arith.constant 0 : index
      %62 = vector.load %arg8[%c0_38, %c0_39] : memref<8x1xf32, #tpu.memory_space<vmem>>, vector<8x1xf32>
      tpu.vector_store %arg8[%c0_38, %c0_39], %61 {strides = array<i32>} : memref<8x1xf32, #tpu.memory_space<vmem>>, vector<8x1xf32>,
    } else {
    }
    %c0 = arith.constant 0 : index
    %c0_1 = arith.constant 0 : index
    %3 = vector.load %arg5[%c0, %c0_1] : memref<8x320xbf16, #tpu.memory_space<vmem>>, vector<8x320xbf16>
    %c0_2 = arith.constant 0 : index
    %c0_3 = arith.constant 0 : index
    %4 = vector.load %arg3[%c0_2, %c0_3] : memref<320x256xbf16, #tpu.memory_space<vmem>>, vector<320x256xbf16>
    %cst = arith.constant dense<0.000000e+00> : vector<8x256xf32>
    %5 = tpu.matmul %3, %4, %cst {dimension_numbers = #tpu.dot_dimension_numbers<[1], [0], [0], [1], [0, 0, 1, 1], [], []>} : vector<8x320xbf16>, vector<320x256xbf16>, vector<8x256xf32> -> vector<8x256xf32>
    %6 = tpu.iota {dimensions = array<i32: 1>} : vector<8x256xi32>
    %c256_i32 = arith.constant 256 : i32
    %7 = arith.muli %arg0, %c256_i32 : i32
    %8 = vector.broadcast %7 : i32 to vector<8x256xi32>
    %9 = arith.addi %6, %8 : vector<8x256xi32>
    %c320_i32 = arith.constant 320 : i32
    %10 = vector.broadcast %c320_i32 : i32 to vector<8x256xi32>
    %11 = arith.cmpi slt, %9, %10 : vector<8x256xi32>
    %cst_4 = arith.constant 0xFF800000 : f32
    %12 = vector.broadcast %cst_4 : f32 to vector<8x256xf32>
    %13 = arith.select %11, %5, %12 : vector<8x256xi1>, vector<8x256xf32>
    %c0_5 = arith.constant 0 : index
    %c0_6 = arith.constant 0 : index
    %14 = vector.load %arg6[%c0_5, %c0_6] : memref<8x1xf32, #tpu.memory_space<vmem>>, vector<8x1xf32>
    %cst_7 = arith.constant dense<0xFF800000> : vector<8xf32>
    %15 = vector.multi_reduction <maximumf>, %13, %cst_7 [1] : vector<8x256xf32> to vector<8xf32>
    %16 = vector.shape_cast %15 : vector<8xf32> to vector<8x1xf32>
    %17 = arith.maximumf %14, %16 : vector<8x1xf32>
    %18 = arith.subf %14, %17 : vector<8x1xf32>
    %19 = math.exp %18 : vector<8x1xf32>
    %20 = vector.broadcast %17 : vector<8x1xf32> to vector<8x256xf32>
    %21 = arith.subf %13, %20 : vector<8x256xf32>
    %22 = math.exp %21 : vector<8x256xf32>
    %c0_8 = arith.constant 0 : index
    %c0_9 = arith.constant 0 : index
    %23 = vector.load %arg7[%c0_8, %c0_9] : memref<8x1xf32, #tpu.memory_space<vmem>>, vector<8x1xf32>
    %24 = arith.mulf %19, %23 : vector<8x1xf32>
    %cst_10 = arith.constant dense<0.000000e+00> : vector<8xf32>
    %25 = vector.multi_reduction <add>, %22, %cst_10 [1] : vector<8x256xf32> to vector<8xf32>
    %26 = vector.shape_cast %25 : vector<8xf32> to vector<8x1xf32>
    %27 = arith.addf %24, %26 : vector<8x1xf32>
    %c0_11 = arith.constant 0 : index
    %c0_12 = arith.constant 0 : index
    %28 = vector.load %arg7[%c0_11, %c0_12] : memref<8x1xf32, #tpu.memory_space<vmem>>, vector<8x1xf32>
    tpu.vector_store %arg7[%c0_11, %c0_12], %27 {strides = array<i32>} : memref<8x1xf32, #tpu.memory_space<vmem>>, vector<8x1xf32>,
    %c0_13 = arith.constant 0 : index
    %c0_14 = arith.constant 0 : index
    %29 = vector.load %arg6[%c0_13, %c0_14] : memref<8x1xf32, #tpu.memory_space<vmem>>, vector<8x1xf32>
    tpu.vector_store %arg6[%c0_13, %c0_14], %17 {strides = array<i32>} : memref<8x1xf32, #tpu.memory_space<vmem>>, vector<8x1xf32>,
    %c0_15 = arith.constant 0 : index
    %c0_16 = arith.constant 0 : index
    %30 = vector.load %arg2[%c0_15, %c0_16] : memref<8x1xi32, #tpu.memory_space<vmem>>, vector<8x1xi32>
    %31 = vector.broadcast %30 : vector<8x1xi32> to vector<8x256xi32>
    %32 = arith.cmpi eq, %9, %31 : vector<8x256xi32>
    %33 = arith.andi %11, %32 : vector<8x256xi1>
    %c0_17 = arith.constant 0 : index
    %c0_18 = arith.constant 0 : index
    %34 = vector.load %arg8[%c0_17, %c0_18] : memref<8x1xf32, #tpu.memory_space<vmem>>, vector<8x1xf32>
    %cst_19 = arith.constant 0.000000e+00 : f32
    %35 = vector.broadcast %cst_19 : f32 to vector<8x256xf32>
    %36 = arith.select %33, %13, %35 : vector<8x256xi1>, vector<8x256xf32>
    %cst_20 = arith.constant dense<0.000000e+00> : vector<8xf32>
    %37 = vector.multi_reduction <add>, %36, %cst_20 [1] : vector<8x256xf32> to vector<8xf32>
    %38 = vector.shape_cast %37 : vector<8xf32> to vector<8x1xf32>
    %39 = arith.addf %34, %38 : vector<8x1xf32>
    %c0_21 = arith.constant 0 : index
    %c0_22 = arith.constant 0 : index
    %40 = vector.load %arg8[%c0_21, %c0_22] : memref<8x1xf32, #tpu.memory_space<vmem>>, vector<8x1xf32>
    tpu.vector_store %arg8[%c0_21, %c0_22], %39 {strides = array<i32>} : memref<8x1xf32, #tpu.memory_space<vmem>>, vector<8x1xf32>,
    %c1_i32 = arith.constant 1 : i32
    %41 = arith.cmpi eq, %arg0, %c1_i32 : i32
    %42 = arith.extui %41 : i1 to i32
    %c0_i32_23 = arith.constant 0 : i32
    %43 = arith.cmpi ne, %42, %c0_i32_23 : i32
    scf.if %43 {
      %c0_24 = arith.constant 0 : index
      %c0_25 = arith.constant 0 : index
      %44 = vector.load %arg6[%c0_24, %c0_25] : memref<8x1xf32, #tpu.memory_space<vmem>>, vector<8x1xf32>
      %c0_26 = arith.constant 0 : index
      %c0_27 = arith.constant 0 : index
      %45 = vector.load %arg7[%c0_26, %c0_27] : memref<8x1xf32, #tpu.memory_space<vmem>>, vector<8x1xf32>
      %46 = math.log %45 : vector<8x1xf32>
      %47 = arith.addf %44, %46 : vector<8x1xf32>
      %c0_28 = arith.constant 0 : index
      %c0_29 = arith.constant 0 : index
      %48 = vector.load %arg8[%c0_28, %c0_29] : memref<8x1xf32, #tpu.memory_space<vmem>>, vector<8x1xf32>
      %49 = arith.subf %47, %48 : vector<8x1xf32>
      %cst_30 = arith.constant dense<0.000000e+00> : vector<1xf32>
      %50 = vector.multi_reduction <add>, %49, %cst_30 [0] : vector<8x1xf32> to vector<1xf32>
      %51 = vector.shape_cast %50 : vector<1xf32> to vector<1x1xf32>
      %cst_31 = arith.constant 1.250000e-01 : f32
      %52 = vector.broadcast %cst_31 : f32 to vector<1x1xf32>
      %53 = arith.mulf %51, %52 : vector<1x1xf32>
      %c0_32 = arith.constant 0 : index
      %c0_33 = arith.constant 0 : index
      %54 = vector.load %arg4[%c0_32, %c0_33] : memref<1x1xf32, #tpu.memory_space<vmem>>, vector<1x1xf32>
      tpu.vector_store %arg4[%c0_32, %c0_33], %53 {strides = array<i32>} : memref<1x1xf32, #tpu.memory_space<vmem>>, vector<1x1xf32>,
    } else {
    }
    return
  }
  func.func @transform_0(%arg0: i32) -> (i32, i32) {
    %c0_i32 = arith.constant 0 : i32
    %c0_i32_0 = arith.constant 0 : i32
    %c0_i32_1 = arith.constant 0 : i32
    return %c0_i32, %c0_i32_0 : i32, i32
  }
  func.func @transform_1(%arg0: i32) -> (i32, i32) {
    %c0_i32 = arith.constant 0 : i32
    %c0_i32_0 = arith.constant 0 : i32
    %c0_i32_1 = arith.constant 0 : i32
    return %c0_i32, %c0_i32_0 : i32, i32
  }
  func.func @transform_2(%arg0: i32) -> (i32, i32) {
    %c0_i32 = arith.constant 0 : i32
    %c0_i32_0 = arith.constant 0 : i32
    return %c0_i32, %arg0 : i32, i32
  }
  func.func @transform_3(%arg0: i32) -> (i32, i32) {
    %c0_i32 = arith.constant 0 : i32
    %c0_i32_0 = arith.constant 0 : i32
    %c0_i32_1 = arith.constant 0 : i32
    return %c0_i32, %c0_i32_0 : i32, i32
  }
}

</mosaic_0001>

<bundles_post_ra>
// kernel: tpu_custom_call.1
= control target key start
LH: loop header
LB: loop body
LE: loop exit
PB: predicated region body
PF: predicated region fallthrough
CT: control target
= control target key end

     0   :  { %8 = vsyncpa [#allocation7], 0  ;;  %s1428_s0 = inlined_call_operand.hbm [shape: f32[8,320], index: 0, kind: input, shape index: {}]   ;;  %s1429_s1 = inlined_call_operand.vmem [shape: s32[8,1], index: 1, kind: input, shape index: {}]   ;;  %s1430_s2 = inlined_call_operand.hbm [shape: bf16[320,320], index: 2, kind: input, shape index: {}]   ;;  %s1431_s3 = inlined_call_operand.hbm [shape: f32[1,1], index: 3, kind: output, shape index: {}]  }
   0x1   :  { %9 = vsyncpa [#allocation10], 0 }
   0x2   :  { %11 = vsyncpa [#allocation10 + $0x1], 0 }
   0x3   :  { %12 = vsyncpa [#allocation8], 0  ;;  %s1190_s12 = smov 0   ;;  %s1192_s13 = smov 0  }
   0x4   :  { %s1194_s14 = smov 0   ;;  %s1196_s15 = smov 0  }
   0x5 LB: > { %s1209_s16 = sadd.s32 4294967295, %s1160_s15   ;;  %s1212_s17 = sadd.s32 1, %s1160_s15   ;;  %s1160_s15 = sphi %s1196_s15, %s1440_s15   ;;  %s1156_s14 = sphi %s1194_s14, %s1439_s14   ;;  %s1152_s13 = sphi %s1192_s13, %s1438_s13   ;;  %s1148_s12 = sphi %s1190_s12, %s1437_s12  }
   0x6   : > { %s64_s18 = ssub.s32 %s1160_s15, %s1212_s17  ;;  %s67_s19 = sadd.s32 1, %s1156_s14 }
   0x7   : > { %p65_p0 = scmp.eq.s32.totalorder %s64_s18, 0  ;;  %p74_p1 = scmp.ne.s32.totalorder %s1156_s14, %s1152_s13 }
   0x8   : > { %p75_p2 = scmp.eq.s32.totalorder %s1160_s15, 0  ;;  %p80_p3 = scmp.ne.s32.totalorder %s1152_s13, %s1148_s12 }
   0x9   : > { %s1222_s20 = scalar_select %p65_p0, %s1156_s14, %s67_s19  }
   0xa   : > { %p1224_p4 = por %p75_p2, %p74_p1  ;;  %p81_p5 = scmp.eq.s32.totalorder %s1209_s16, 0 }
   0xb   : > { %p730_p6 = scmp.ge.s32.totalorder %s1160_s15, 1  ;;  %p112_p7 = scmp.lt.s32.totalorder %s1160_s15, 3 }
   0xc   : > { %p1233_p8 = por %p81_p5, %p80_p3  ;;  %s124_s26 = sshll.u32 %s1428_s0, 4  ;;  %s125_s26 = int_to_ptr.hbm [resolvable:$true] %s124_s26 }
   0xd   : > { %p1238_p10 = pnand %p730_p6, %p112_p7  ;;  %s1162_s27 = smov [#allocation6]  }
   0xe   : > { %s126_s28 = sshll.u32 %s1162_s27, 4  ;;  %p732_p13 = scmp.ge.s32.totalorder %s1160_s15, 2  ;;  %s127_s28 = int_to_ptr.vmem [resolvable:$true] %s126_s28 }
   0xf   : > { %p962_p11 = pneg %p1238_p10 }
  0x10   : > { %136 = sbr.rel (%p732_p13) target bundleno = 64 (0x40), region = 24 }
  0x11   : > { %p963_p12 = pnand %p962_p11, %p81_p5 }
  0x13   : > { %965 = dma.hbm_to_vmem [thread:$0]  (!%p963_p12), %s125_s26, 384, %s127_s28, [#allocation7]  }
  0x15   : > { %139 = sbr.rel (!%p1224_p4) target bundleno = 64 (0x40), region = 28  ;;  %s140_s29 = sand.u32 (%p1224_p4), 1, %s1156_s14  }
  0x16   : > { %s733_s30 = sshll.u32 (%p1224_p4), %s1160_s15, 1  ;;  %s951_s4 = smul.u32 (%p1224_p4), 320, %s140_s29 }
  0x17   : > { %s146_s5 = ssub.s32 (%p1224_p4), 3, %s733_s30  ;;  %s1257_s9 = scalar_lea.sflag (%p1224_p4), [#allocation10], %s140_s29 }
  0x18   : > { %p147_p0 = scmp.lt.s32.totalorder (%p1224_p4), %s146_s5, 2  ;;  %s144_s10 = scalar_lea.vmem (%p1224_p4), [#allocation9], %s951_s4 }
  0x1a   : > { %s1442_s5 = smov (!%p147_p0, %s146_s5), 2 }
  0x1b   : > { %s149_s6 = smul.u32 160, %s1442_s5 }
  0x1d   : > { %s150_s7 = ssub.s32 320, %s149_s6 }
  0x1e   : > { %s151_s8 = sshll.u32 %s150_s7, 4 }
  0x1f   : > { %152 = vsyncadd %s1257_s9, %s151_s8  ;;  %p1260_p1 = scmp.ne.s32.totalorder %s149_s6, 0  ;;  %s910_s12 = sshll.u32 %s1160_s15, 3 }
  0x20   : > { %s155_s21 = scalar_lea.hbm %s1430_s2, %s910_s12  ;;  %s736_s24 = sshll.u32 %s1442_s5, 2 }
  0x21   : > { %s158_s25 = sshll.u32 %s155_s21, 4  ;;  %s1269_s26 = sshll.u32 %s144_s10, 4  ;;  %s1271_s25 = int_to_ptr.hbm [resolvable:$true] %s158_s25  ;;  %s161_s26 = int_to_ptr.vmem [resolvable:$true] %s1269_s26 }
  0x22   : > { %s1275_s27 = smul.u32 2560, %s1442_s5  ;;  %s1051_s28 = sshra.s32 %s1271_s25, 4  ;;  %s1052_s28 = int_to_ptr.hbm [resolvable:$true] %s1051_s28 }
  0x23   : > { %s1062_s8 = scalar_lea.hbm %s1430_s2, 480  ;;  %p1063_p7 = scmp.lt.s32.totalorder %s1052_s28, %s1430_s2 }
  0x24   : > { %s1053_s15 = sshrl.u32 %s1275_s27, 4 }
  0x25   : > { %s1089_s29 = sshll.u32 %s1053_s15, 4  ;;  %s1056_s30 = sadd.s32 1, %s1053_s15 }
  0x26   : > { %p1055_p2 = scmp.ne.s32.totalorder %s1089_s29, %s1275_s27 }
  0x28   : > { %s1444_s30 = smov (!%p1055_p2, %s1056_s30), %s1053_s15 }
  0x29   : > { %s1058_s4 = scalar_lea.hbm %s1052_s28, %s1444_s30 }
  0x2a   : > { %p1059_p3 = scmp.ne.s32.totalorder %s1052_s28, %s1058_s4  ;;  %p1064_p11 = scmp.lt.s32.totalorder %s1062_s8, %s1058_s4 }
  0x2c   : > { %p1060_p4 = pnand %p1059_p3, %p1260_p1  ;;  %p1065_p12 = por %p1064_p11, %p1063_p7 }
  0x2e   : > { %p1061_p6 = pneg %p1060_p4 }
  0x30   : > { %p1066_p13 = pnand %p1065_p12, %p1061_p6 }
  0x32   : > { %1069 = shalt.err (!%p1066_p13)
}
  0x33   : > { %s1070_s18 = sshra.s32 %s161_s26, 4  ;;  %s1163_s21 = smov [#allocation9]   ;;  %s1071_s18 = int_to_ptr.vmem [resolvable:$true] %s1070_s18 }
  0x34   : > { %s1077_s19 = scalar_lea.vmem %s1071_s18, %s1444_s30  ;;  %s1081_s15 = scalar_lea.vmem %s1163_s21, 640 }
  0x35   : > { %p1078_p0 = scmp.ne.s32.totalorder %s1071_s18, %s1077_s19  ;;  %p1083_p4 = scmp.lt.s32.totalorder %s1081_s15, %s1077_s19 }
  0x37   : > { %p1079_p2 = pnand %p1078_p0, %p1260_p1 }
  0x39   : > { %p1080_p3 = pneg %p1079_p2 }
  0x3b   : > { %p1085_p9 = pnand %p1083_p4, %p1080_p3 }
  0x3d   : > { %1088 = shalt.err (!%p1085_p9)
}
  0x3e   : > { %s1164_s28 = smov 192   ;;  %s1165_s29 = smov 128  }
  0x3f   : > { %166 = dma.hbm_to_vmem [thread:$0]  (%p1260_p1), %s1271_s25, %s1275_s27, %s161_s26, %s1257_s9, %s1164_s28, %s1165_s29, %s736_s24  }
  0x40 PF: > { %172 = sbr.rel (%p1238_p10) target bundleno = 830 (0x33e), region = 32 }
  0x45   : > { %1135 = dma.done.wait (%p81_p5), [#allocation7], 384  }
  0x46   : > { %1137 = vsyncadd (%p81_p5), [#allocation7], 4294966912  ;;  %s179_s30 = sand.u32 1, %s1152_s13  }
  0x47   : > { %s952_s4 = smul.u32 320, %s179_s30  ;;  %s180_s6 = scalar_lea.sflag [#allocation10], %s179_s30 }
  0x49   : > { %s1308_s11 = scalar_lea.vmem [#allocation9], %s952_s4 }
  0x4a   : > { %1139 = dma.done.wait (%p1233_p8), %s180_s6, 5120  }
  0x4b   : > { %1141 = vsyncadd (%p1233_p8), %s180_s6, 4294962176  ;;  %p1436_p9 = scmp.ne.s32.totalorder %s1209_s16, 0 }
  0x4d   : > { %211 = sbr.rel (%p1436_p9) target bundleno = 233 (0xe9), region = 44 }
  0x52   : > { %v212_v0 = vld [vmem:[#allocation6] sm:$0xff]  ;;  %v213_v1 = vld [vmem:[#allocation6 + $0x8] sm:$0xff]  ;;  %v214_v2 = vld [vmem:[#allocation6 + $0x10] sm:$0xff]  ;;  %vm219_vm0 = vcmask 523264   ;;  %vm244_vm1 = vcmask 7168   ;;  %v1166_v9 = vmov -inf  }
  0x53   : > { %v215_v3 = vmul.f32 %v212_v0, %v212_v0  ;;  %v216_v4 = vmul.f32 %v213_v1, %v213_v1  ;;  %v217_v5 = vmul.f32 %v214_v2, %v214_v2  ;;  %245 = vst.msk [vmem:[#allocation3] sm:$0xff] %vm244_vm1, %v1166_v9  ;;  %v1167_v10 = vmov 0.0  }
  0x54   : > { %246 = vst.msk [vmem:[#allocation4] sm:$0xff] %vm244_vm1, %v1167_v10  ;;  %vm242_vm5 = vcmask 519168  }
  0x55   : > { %v218_v6 = vadd.f32 %v216_v4, %v215_v3  ;;  %v220_v7 = vsel %vm219_vm0, %v217_v5, 0.0  ;;  %247 = vst.msk [vmem:[#allocation5] sm:$0xff] %vm244_vm1, %v1167_v10 }
  0x57   : > { %v221_v8 = vadd.f32 %v220_v7, %v218_v6 }
  0x59   : > { %222 = vadd.xlane.f32.xlu0 %v221_v8 }
  0xcc   : > { %v223_v11 = vpop.xlane.xlu0 %222 }
  0xcd   : > { %v224_v12 = vmax.f32 %v223_v11, 1e-24 }
  0xcf   : > { %1009 = vrsqrt.f32 %v224_v12  ;;  %vm231_vm3 = vweird.f32 %v224_v12 }
  0xd5   : > { %v1010_v13 = vpop.eup %1009 }
  0xd6   : > { %v226_v14 = vmul.f32 %v1010_v13, %v224_v12  ;;  %vm232_vm2 = vweird.f32 %v1010_v13 }
  0xd7   : > { %vm233_vm4 = vmor %vm231_vm3, %vm232_vm2 }
  0xd8   : > { %v227_v15 = vmul.f32 %v1010_v13, %v226_v14 }
  0xda   : > { %v228_v16 = vmul.f32 0.5, %v227_v15 }
  0xdc   : > { %v229_v17 = vsub.f32 1.5, %v228_v16 }
  0xde   : > { %v230_v18 = vmul.f32 %v1010_v13, %v229_v17 }
  0xe0   : > { %v234_v19 = vsel %vm233_vm4, %v1010_v13, %v230_v18 }
  0xe1   : > { %v235_v20 = vmul.f32 20.0, %v234_v19 }
  0xe3   : > { %v236_v21 = vmul.f32 %v235_v20, %v212_v0  ;;  %v237_v22 = vmul.f32 %v235_v20, %v213_v1  ;;  %v238_v23 = vmul.f32 %v235_v20, %v214_v2 }
  0xe5   : > { %v239_v24 = vpack.c.bf16 %v237_v22, %v236_v21  ;;  %v240_v25 = vpack.c.bf16 %v238_v23, %v238_v23 }
  0xe7   : > { %241 = vst [vmem:[#allocation2] sm:$0xff] %v239_v24 }
  0xe8   : > { %243 = vst.msk [vmem:[#allocation2 + $0x8] sm:$0xf] %vm242_vm5, %v240_v25 }
  0xe9 PF: > { %v800_v26 = vld [vmem:[%s1308_s11 + $0x70] sm:$0xf]  ;;  %v926_v27 = vld [vmem:[%s1308_s11 + $0x74] sm:$0xf0]  ;;  %v792_v35 = vld [vmem:[%s1308_s11 + $0x60] sm:$0xf] }
  0xea   : > { %v896_v28 = vld [vmem:[%s1308_s11 + $0x130] sm:$0xf]  ;;  %v801_v29 = vor.u32 %v926_v27, %v800_v26  ;;  %v950_v30 = vld [vmem:[%s1308_s11 + $0x134] sm:$0xf0]  ;;  %v924_v36 = vld [vmem:[%s1308_s11 + $0x64] sm:$0xf0] }
  0xeb   : > { %v864_v31 = vld [vmem:[%s1308_s11 + $0xf0] sm:$0xf]  ;;  %v942_v32 = vld [vmem:[%s1308_s11 + $0xf4] sm:$0xf0]  ;;  %v897_v33 = vor.u32 %v950_v30, %v896_v28  ;;  %v888_v37 = vld [vmem:[%s1308_s11 + $0x120] sm:$0xf]  ;;  %v793_v38 = vor.u32 %v924_v36, %v792_v35 }
  0xec   : > { %v865_v34 = vor.u32 %v942_v32, %v864_v31  ;;  %504 = vmatpush.bf16.msra.mxu0 %v801_v29  ;;  %v948_v39 = vld [vmem:[%s1308_s11 + $0x124] sm:$0xf0]  ;;  %v856_v40 = vld [vmem:[%s1308_s11 + $0xe0] sm:$0xf]  ;;  %v925_v44 = vld [vmem:[%s1308_s11 + $0x74] sm:$0xf] }
  0xed   : > { %v940_v41 = vld [vmem:[%s1308_s11 + $0xe4] sm:$0xf0]  ;;  %534 = vmatpush.bf16.msra.mxu2 %v897_v33  ;;  %v889_v42 = vor.u32 %v948_v39, %v888_v37  ;;  %v802_v45 = vld [vmem:[%s1308_s11 + $0x78] sm:$0xf0]  ;;  %v784_v46 = vld [vmem:[%s1308_s11 + $0x50] sm:$0xf] }
  0xee   : > { %517 = vmatpush.bf16.msra.mxu1 %v865_v34  ;;  %v857_v43 = vor.u32 %v940_v41, %v856_v40  ;;  %v805_v47 = vor.u32 %v925_v44, %v802_v45  ;;  %v922_v48 = vld [vmem:[%s1308_s11 + $0x54] sm:$0xf0]  ;;  %v880_v49 = vld [vmem:[%s1308_s11 + $0x110] sm:$0xf]  ;;  %v923_v53 = vld [vmem:[%s1308_s11 + $0x64] sm:$0xf] }
  0xef   : > { %v946_v50 = vld [vmem:[%s1308_s11 + $0x114] sm:$0xf0]  ;;  %v848_v51 = vld [vmem:[%s1308_s11 + $0xd0] sm:$0xf]  ;;  %v785_v54 = vor.u32 %v922_v48, %v784_v46  ;;  %v794_v55 = vld [vmem:[%s1308_s11 + $0x68] sm:$0xf0] }
  0xf0   : > { %v938_v52 = vld [vmem:[%s1308_s11 + $0xd4] sm:$0xf0]  ;;  %505 = vmatpush.bf16.msra.mxu0 %v793_v38  ;;  %543 = vmatpush.bf16.msra.mxu3 %v805_v47  ;;  %v776_v56 = vld [vmem:[%s1308_s11 + $0x40] sm:$0xf]  ;;  %v920_v57 = vld [vmem:[%s1308_s11 + $0x44] sm:$0xf0]  ;;  %v881_v58 = vor.u32 %v946_v50, %v880_v49  ;;  %v797_v60 = vor.u32 %v923_v53, %v794_v55 }
  0xf1   : > { %535 = vmatpush.bf16.msra.mxu2 %v889_v42  ;;  %v849_v59 = vor.u32 %v938_v52, %v848_v51  ;;  %v872_v61 = vld [vmem:[%s1308_s11 + $0x100] sm:$0xf]  ;;  %v944_v62 = vld [vmem:[%s1308_s11 + $0x104] sm:$0xf0]  ;;  %v921_v1 = vld [vmem:[%s1308_s11 + $0x54] sm:$0xf]  ;;  %v777_v5 = vor.u32 %v920_v57, %v776_v56 }
  0xf2   : > { %518 = vmatpush.bf16.msra.mxu1 %v857_v43  ;;  %v840_v63 = vld [vmem:[%s1308_s11 + $0xc0] sm:$0xf]  ;;  %v936_v0 = vld [vmem:[%s1308_s11 + $0xc4] sm:$0xf0]  ;;  %v786_v2 = vld [vmem:[%s1308_s11 + $0x58] sm:$0xf0]  ;;  %v873_v8 = vor.u32 %v944_v62, %v872_v61 }
  0xf3   : > { %v941_v3 = vld [vmem:[%s1308_s11 + $0xf4] sm:$0xf]  ;;  %v866_v4 = vld [vmem:[%s1308_s11 + $0xf8] sm:$0xf0]  ;;  %v789_v6 = vor.u32 %v921_v1, %v786_v2  ;;  %v768_v7 = vld [vmem:[%s1308_s11 + $0x30] sm:$0xf]  ;;  %v841_v9 = vor.u32 %v936_v0, %v840_v63 }
  0xf4   : > { %506 = vmatpush.bf16.msra.mxu0 %v785_v54  ;;  %544 = vmatpush.bf16.msra.mxu3 %v797_v60  ;;  %v918_v10 = vld [vmem:[%s1308_s11 + $0x34] sm:$0xf0]  ;;  %v919_v11 = vld [vmem:[%s1308_s11 + $0x44] sm:$0xf]  ;;  %v778_v12 = vld [vmem:[%s1308_s11 + $0x48] sm:$0xf0]  ;;  %v869_v13 = vor.u32 %v941_v3, %v866_v4 }
  0xf5   : > { %536 = vmatpush.bf16.msra.mxu2 %v881_v58  ;;  %v832_v14 = vld [vmem:[%s1308_s11 + $0xb0] sm:$0xf]  ;;  %v934_v15 = vld [vmem:[%s1308_s11 + $0xb4] sm:$0xf0]  ;;  %v939_v16 = vld [vmem:[%s1308_s11 + $0xe4] sm:$0xf]  ;;  %v769_v19 = vor.u32 %v918_v10, %v768_v7  ;;  %v781_v20 = vor.u32 %v919_v11, %v778_v12 }
  0xf6   : > { %519 = vmatpush.bf16.msra.mxu1 %v849_v59  ;;  %v858_v17 = vld [vmem:[%s1308_s11 + $0xe8] sm:$0xf0]  ;;  %v760_v21 = vld [vmem:[%s1308_s11 + $0x20] sm:$0xf]  ;;  %v833_v23 = vor.u32 %v934_v15, %v832_v14  ;;  %v916_v24 = vld [vmem:[%s1308_s11 + $0x24] sm:$0xf0] }
  0xf7   : > { %v249_v18 = vld [vmem:[#allocation2 + $0x8] sm:$0xf]  ;;  %v917_v25 = vld [vmem:[%s1308_s11 + $0x34] sm:$0xf]  ;;  %v770_v26 = vld [vmem:[%s1308_s11 + $0x38] sm:$0xf0]  ;;  %v861_v27 = vor.u32 %v939_v16, %v858_v17  ;;  %v761_v33 = vor.u32 %v916_v24, %v760_v21 }
  0xf8   : > { %507 = vmatpush.bf16.msra.mxu0 %v777_v5  ;;  %545 = vmatpush.bf16.msra.mxu3 %v789_v6  ;;  %v294_v22 = vunpack.c.l.b16 %v249_v18  ;;  %vm500_vm6 = vcmask 523264   ;;  %v824_v29 = vld [vmem:[%s1308_s11 + $0xa0] sm:$0xf]  ;;  %v932_v30 = vld [vmem:[%s1308_s11 + $0xa4] sm:$0xf0]  ;;  %v773_v34 = vor.u32 %v917_v25, %v770_v26  ;;  %v1168_v5 = vmov 0  }
  0xf9   : > { %537 = vmatpush.bf16.msra.mxu2 %v873_v8  ;;  %v937_v31 = vld [vmem:[%s1308_s11 + $0xd4] sm:$0xf]  ;;  %v850_v32 = vld [vmem:[%s1308_s11 + $0xd8] sm:$0xf0]  ;;  %v752_v35 = vld [vmem:[%s1308_s11 + $0x10] sm:$0xf]  ;;  %v825_v36 = vor.u32 %v932_v30, %v824_v29  ;;  %1012 = vset.pattern.permute.xlu1 %v1168_v5 }
  0xfa   : > { %520 = vmatpush.bf16.msra.mxu1 %v841_v9  ;;  %v1360_v28 = vpack.c.b16 %v294_v22, %v294_v22  ;;  %v914_v37 = vld [vmem:[%s1308_s11 + $0x14] sm:$0xf0]  ;;  %v915_v38 = vld [vmem:[%s1308_s11 + $0x24] sm:$0xf]  ;;  %v762_v39 = vld [vmem:[%s1308_s11 + $0x28] sm:$0xf0]  ;;  %v853_v40 = vor.u32 %v937_v31, %v850_v32  ;;  %1011 = vset.pattern.permute.xlu0 %v1168_v5 }
  0xfb   : > { %v816_v41 = vld [vmem:[%s1308_s11 + $0x90] sm:$0xf]  ;;  %v930_v42 = vld [vmem:[%s1308_s11 + $0x94] sm:$0xf0]  ;;  %v935_v43 = vld [vmem:[%s1308_s11 + $0xc4] sm:$0xf]  ;;  %v753_v45 = vor.u32 %v914_v37, %v752_v35  ;;  %v765_v46 = vor.u32 %v915_v38, %v762_v39 }
  0xfc   : > { %508 = vmatpush.bf16.msra.mxu0 %v769_v19  ;;  %546 = vmatpush.bf16.msra.mxu3 %v781_v20  ;;  %v842_v44 = vld [vmem:[%s1308_s11 + $0xc8] sm:$0xf0]  ;;  %v744_v47 = vld [vmem:[%s1308_s11] sm:$0xf]  ;;  %v912_v48 = vld [vmem:[%s1308_s11 + $0x4] sm:$0xf0]  ;;  %v817_v50 = vor.u32 %v930_v42, %v816_v41 }
  0xfd   : > { %556 = vmatpush.bf16.msrb.mxu2 %v869_v13  ;;  %v248_v49 = vld [vmem:[#allocation2] sm:$0xff]  ;;  %v808_v51 = vld [vmem:[%s1308_s11 + $0x80] sm:$0xf]  ;;  %v913_v52 = vld [vmem:[%s1308_s11 + $0x14] sm:$0xf]  ;;  %v845_v54 = vor.u32 %v935_v43, %v842_v44  ;;  %v745_v61 = vor.u32 %v912_v48, %v744_v47  ;;  %s904_s5 = sshll.u32 %s1209_s16, 8 }
  0xfe   : > { %521 = vmatpush.bf16.msra.mxu1 %v833_v23  ;;  %902 = vmatmul.msk.bf16.vlgmr.msra.gmra.mxu2 %vm500_vm6, %v1360_v28  ;;  %v754_v53 = vld [vmem:[%s1308_s11 + $0x18] sm:$0xf0]  ;;  %v928_v55 = vld [vmem:[%s1308_s11 + $0x84] sm:$0xf0]  ;;  %v949_v56 = vld [vmem:[%s1308_s11 + $0x134] sm:$0xf]  ;;  %v292_v60 = vunpack.c.l.b16 %v248_v49  ;;  %v293_v63 = vunpack.c.h.b16 %v248_v49  ;;  %v586_v39 = vstv %s904_s5 }
  0xff   : > { %v898_v57 = vld [vmem:[%s1308_s11 + $0x138] sm:$0xf0]  ;;  %v933_v58 = vld [vmem:[%s1308_s11 + $0xb4] sm:$0xf]  ;;  %v757_v62 = vor.u32 %v913_v52, %v754_v53  ;;  %v621_v0 = vld [vmem:[%s1429_s1] sm:$0xff]  ;;  %v809_v1 = vor.u32 %v928_v55, %v808_v51  ;;  %vm618_vm13 = vcmask 7168  }
 0x100   : > { %509 = vmatpush.bf16.msra.mxu0 %v761_v33  ;;  %547 = vmatpush.bf16.msra.mxu3 %v773_v34  ;;  %v834_v59 = vld [vmem:[%s1308_s11 + $0xb8] sm:$0xf0]  ;;  %v901_v2 = vor.u32 %v949_v56, %v898_v57  ;;  %v911_v3 = vld [vmem:[%s1308_s11 + $0x4] sm:$0xf]  ;;  %v746_v4 = vld [vmem:[%s1308_s11 + $0x8] sm:$0xf0]  ;;  %v295_v9 = vpack.c.b16 %v292_v60, %v292_v60  ;;  %v296_v12 = vpack.c.b16 %v293_v63, %v293_v63  ;;  %v582_v33 = vlaneseq }
 0x101   : > { %557 = vmatpush.bf16.msrb.mxu2 %v861_v27  ;;  %v837_v6 = vor.u32 %v933_v58, %v834_v59  ;;  %v947_v7 = vld [vmem:[%s1308_s11 + $0x124] sm:$0xf]  ;;  %v890_v8 = vld [vmem:[%s1308_s11 + $0x128] sm:$0xf0]  ;;  %623 = vperm.xlu1 %1012, %v621_v0   ;;  %v749_v13 = vor.u32 %v911_v3, %v746_v4  ;;  %v945_v16 = vld [vmem:[%s1308_s11 + $0x114] sm:$0xf] }
 0x102   : > { %522 = vmatpush.bf16.msra.mxu1 %v825_v36  ;;  %v931_v10 = vld [vmem:[%s1308_s11 + $0xa4] sm:$0xf]  ;;  %v826_v11 = vld [vmem:[%s1308_s11 + $0xa8] sm:$0xf0]  ;;  %v893_v14 = vor.u32 %v947_v7, %v890_v8  ;;  %v882_v17 = vld [vmem:[%s1308_s11 + $0x118] sm:$0xf0] }
 0x103   : > { %v829_v15 = vor.u32 %v931_v10, %v826_v11  ;;  %v929_v18 = vld [vmem:[%s1308_s11 + $0x94] sm:$0xf]  ;;  %v818_v19 = vld [vmem:[%s1308_s11 + $0x98] sm:$0xf0]  ;;  %v885_v20 = vor.u32 %v945_v16, %v882_v17  ;;  %v943_v22 = vld [vmem:[%s1308_s11 + $0x104] sm:$0xf] }
 0x104   : > { %510 = vmatpush.bf16.msra.mxu0 %v753_v45  ;;  %548 = vmatpush.bf16.msra.mxu3 %v765_v46  ;;  %v821_v21 = vor.u32 %v929_v18, %v818_v19  ;;  %v874_v23 = vld [vmem:[%s1308_s11 + $0x108] sm:$0xf0]  ;;  %v927_v24 = vld [vmem:[%s1308_s11 + $0x84] sm:$0xf]  ;;  %v583_v36 = vand.u32 127, %v582_v33  ;;  %v593_v57 = vld [vmem:[#allocation3] sm:$0xff] }
 0x105   : > { %558 = vmatpush.bf16.msrb.mxu2 %v853_v40  ;;  %v810_v25 = vld [vmem:[%s1308_s11 + $0x88] sm:$0xf0]  ;;  %v877_v26 = vor.u32 %v943_v22, %v874_v23  ;;  %v629_v58 = vld [vmem:[#allocation5] sm:$0xff]  ;;  %v612_v10 = vld [vmem:[#allocation4] sm:$0xff]  ;;  %p905_p5 = scmp.ne.s32.totalorder %s1209_s16, 1 }
 0x106   : > { %523 = vmatpush.bf16.msra.mxu1 %v817_v50  ;;  %v813_v27 = vor.u32 %v927_v24, %v810_v25  ;;  %v584_v38 = vadd.s32 128, %v583_v36  ;;  %v587_v41 = vadd.s32 %v586_v39, %v583_v36 }
 0x108   : > { %511 = vmatpush.bf16.msra.mxu0 %v745_v61  ;;  %549 = vmatpush.bf16.msra.mxu3 %v757_v62  ;;  %v588_v43 = vadd.s32 %v586_v39, %v584_v38  ;;  %vm589_vm8 = vcmp.lt.s32.totalorder %v587_v41, 320 }
 0x109   : > { %559 = vmatpush.bf16.msrb.mxu2 %v845_v54 }
 0x10a   : > { %524 = vmatpush.bf16.msra.mxu1 %v809_v1  ;;  %vm590_vm10 = vcmp.lt.s32.totalorder %v588_v43, 320 }
 0x10b   : > { %512 = vmatmul.bf16.vlgmr.msra.gmra.mxu0 %v295_v9 }
 0x10c   : > { %573 = vmatpush.bf16.msrb.mxu0 %v901_v2  ;;  %550 = vmatpush.bf16.msra.mxu3 %v749_v13 }
 0x10d   : > { %560 = vmatpush.bf16.msrb.mxu2 %v837_v6  ;;  %525 = vmatmul.bf16.vlgmr.msra.gmra.mxu1 %v296_v12 }
 0x10f   : > { %551 = vmatmul.bf16.vlgmr.msra.gmra.mxu3 %v295_v9 }
 0x110   : > { %574 = vmatpush.bf16.msrb.mxu0 %v893_v14 }
 0x111   : > { %561 = vmatpush.bf16.msrb.mxu2 %v829_v15 }
 0x114   : > { %575 = vmatpush.bf16.msrb.mxu0 %v885_v20 }
 0x115   : > { %562 = vmatpush.bf16.msrb.mxu2 %v821_v21 }
 0x118   : > { %576 = vmatpush.bf16.msrb.mxu0 %v877_v26 }
 0x119   : > { %563 = vmatpush.bf16.msrb.mxu2 %v813_v27 }
 0x11b   : > { %903 = vmatmul.msk.bf16.vlgmr.msrb.gmra.mxu0 %vm500_vm6, %v1360_v28 }
 0x11c   : > { %564 = vmatmul.bf16.vlgmr.msrb.gmra.mxu2 %v296_v12 }
 0x173   : > { %v624_v42 = vpop.permute.xlu1 %623 }
 0x174   : > { %vm625_vm7 = vcmp.eq.s32.totalorder %v587_v41, %v624_v42  ;;  %vm626_vm9 = vcmp.eq.s32.totalorder %v588_v43, %v624_v42 }
 0x175   : > { %vm627_vm11 = vmand %vm589_vm8, %vm625_vm7 }
 0x176   : > { %vm628_vm12 = vmand %vm590_vm10, %vm626_vm9 }
 0x181   : > { %v539_v29 = vpop.f32.mrf.mxu2 }
 0x188   : > { %v513_v30 = vpop.f32.mrf.mxu0 }
 0x189   : > { %v541_v31 = vpop.f32.mrf.mxu2 }
 0x18a   : > { %v526_v32 = vpop.f32.mrf.mxu1 }
 0x18b   : > { %v527_v40 = vadd.f32 %v526_v32, %v513_v30 }
 0x18d   : > { %v540_v46 = vadd.f32 %v539_v29, %v527_v40 }
 0x18f   : > { %v591_v49 = vsel %vm589_vm8, %v540_v46, -inf }
 0x190   : > { %v515_v34 = vpop.f32.mrf.mxu0  ;;  %v630_v53 = vsel %vm627_vm11, %v591_v49, 0.0 }
 0x192   : > { %v528_v35 = vpop.f32.mrf.mxu1  ;;  %v552_v37 = vpop.f32.mrf.mxu3 }
 0x198   : > { %v578_v44 = vpop.f32.mrf.mxu0 }
 0x19a   : > { %v554_v45 = vpop.f32.mrf.mxu3 }
 0x19f   : > { %v565_v28 = vpop.f32.mrf.mxu2 }
 0x1a0   : > { %v566_v47 = vadd.f32 %v565_v28, %v552_v37  ;;  %v580_v50 = vpop.f32.mrf.mxu0 }
 0x1a2   : > { %v579_v48 = vadd.f32 %v578_v44, %v566_v47 }
 0x1a4   : > { %v592_v51 = vsel %vm590_vm10, %v579_v48, -inf }
 0x1a5   : > { %v594_v52 = vmax.f32 %v591_v49, %v592_v51  ;;  %v631_v54 = vsel %vm628_vm12, %v592_v51, 0.0 }
 0x1a6   : > { %v632_v55 = vadd.f32 %v631_v54, %v630_v53 }
 0x1a7   : > { %v567_v56 = vpop.f32.mrf.mxu2  ;;  %595 = vmax.xlane.f32.xlu0 %v594_v52 }
 0x1a8   : > { %633 = vadd.xlane.f32.xlu2 %v632_v55 }
 0x21a   : > { %v596_v59 = vpop.xlane.xlu0 %595 }
 0x21b   : > { %v597_v60 = vmax.f32 %v593_v57, %v596_v59  ;;  %v634_v61 = vpop.xlane.xlu2 %633 }
 0x21c   : > { %v635_v62 = vadd.f32 %v634_v61, %v629_v58 }
 0x21d   : > { %v598_v63 = vsub.f32 %v593_v57, %v597_v60  ;;  %620 = vst.msk [vmem:[#allocation3] sm:$0xff] %vm618_vm13, %v597_v60  ;;  %603 = vperm.xlu0 %1011, %v597_v60  }
 0x21e   : > { %636 = vst.msk [vmem:[#allocation5] sm:$0xff] %vm618_vm13, %v635_v62 }
 0x21f   : > { %v599_v8 = vmul.f32 1.442695, %v598_v63 }
 0x28f   : > { %v604_v0 = vpop.permute.xlu0 %603 }
 0x290   : > { %v606_v1 = vsub.f32 %v591_v49, %v604_v0  ;;  %v607_v2 = vsub.f32 %v592_v51, %v604_v0 }
 0x292   : > { %v608_v3 = vmul.f32 1.442695, %v606_v1  ;;  %v610_v4 = vmul.f32 1.442695, %v607_v2 }
 0x294   : > { %1013 = vpow2.f32 %v608_v3 }
 0x295   : > { %1015 = vpow2.f32 %v610_v4 }
 0x296   : > { %1017 = vpow2.f32 %v599_v8 }
 0x29a   : > { %v1014_v5 = vpop.eup %1013 }
 0x29b   : > { %v1016_v6 = vpop.eup %1015 }
 0x29c   : > { %v614_v7 = vadd.f32 %v1016_v6, %v1014_v5  ;;  %v1018_v9 = vpop.eup %1017 }
 0x29d   : > { %v613_v11 = vmul.f32 %v1018_v9, %v612_v10 }
 0x29e   : > { %615 = vadd.xlane.f32.xlu1 %v614_v7 }
 0x310   : > { %640 = sbr.rel (%p905_p5) target bundleno = 825 (0x339), region = 48 }
 0x311   : > { %v616_v12 = vpop.xlane.xlu1 %615 }
 0x312   : > { %v617_v13 = vadd.f32 %v616_v12, %v613_v11 }
 0x314   : > { %619 = vst.msk [vmem:[#allocation4] sm:$0xff] %vm618_vm13, %v617_v13 }
 0x315   : > { %v641_v16 = vld [vmem:[#allocation3] sm:$0xff]  ;;  %v646_v18 = vld [vmem:[#allocation5] sm:$0xff]  ;;  %vm656_vm14 = vcmask 0  }
 0x31b   : > { %v642_v14 = vld [vmem:[#allocation4] sm:$0xff] }
 0x31c   : > { %1019 = vlog2.f32 %v642_v14 }
 0x322   : > { %v1020_v15 = vpop.eup %1019 }
 0x323   : > { %v644_v17 = vmul.f32 0.6931472, %v1020_v15 }
 0x325   : > { %v645_v19 = vadd.f32 %v644_v17, %v641_v16 }
 0x327   : > { %v647_v20 = vsub.f32 %v645_v19, %v646_v18 }
 0x329   : > { %v648_v21 = vsel %vm618_vm13, %v647_v20, 0.0 }
 0x32a   : > { %v649_v22 = vrot.slane %v648_v21, 4 }
 0x32c   : > { %v650_v23 = vadd.f32 %v649_v22, %v648_v21 }
 0x32e   : > { %v651_v24 = vrot.slane %v650_v23, 2 }
 0x330   : > { %v652_v25 = vadd.f32 %v651_v24, %v650_v23 }
 0x332   : > { %v653_v26 = vrot.slane %v652_v25, 1 }
 0x334   : > { %v654_v27 = vadd.f32 %v653_v26, %v652_v25 }
 0x336   : > { %v655_v29 = vmul.f32 0.125, %v654_v27 }
 0x338   : > { %657 = vst.msk [vmem:[#allocation11] sm:$0x1] %vm656_vm14, %v655_v29 }
 0x339 PF: > { %p968_p8 = scmp.eq.s32.totalorder %s1209_s16, 1  ;;  %s1169_s9 = smov [#allocation11]  }
 0x33a   : > { %s664_s24 = sshll.u32 %s1169_s9, 4  ;;  %s666_s27 = sshll.u32 %s1431_s3, 4  ;;  %s665_s24 = int_to_ptr.vmem [resolvable:$true] %s664_s24  ;;  %s667_s27 = int_to_ptr.hbm [resolvable:$true] %s666_s27 }
 0x33b   : > { %959 = dma.vmem_to_hbm [thread:$0]  (%p968_p8), %s665_s24, 16, %s667_s27, [#allocation8]  }
 0x33c   : > { %1143 = dma.done.wait (%p968_p8), [#allocation8], 16  }
 0x33d   : > { %1145 = vsyncadd (%p968_p8), [#allocation8], 4294967280 }
 0x33e PF: > { %p15_p10 = scmp.ge.s32.totalorder %s1212_s17, 4   ;;  %s1437_s12 = smov %s1152_s13 }
 0x33f   : > { %s1438_s13 = smov %s1156_s14  ;;  %s1439_s14 = smov %s1222_s20 }
 0x340   : > { %s1440_s15 = smov %s1212_s17  ;;  %17 = sbr.rel (!%p15_p10) target bundleno = 5 (0x5), region = 82 }
 0x345   :  { %680 = vsyncpa [#allocation7], 1 }
 0x346   :  { %682 = vsyncpa [#allocation7 + $0x1], 1 }
 0x347   :  { %683 = vsyncpa [#allocation10], 1 }
 0x348   :  { %685 = vsyncpa [#allocation10 + $0x1], 1 }
 0x349   :  { %686 = vsyncpa [#allocation8], 1 }
 0x34a   :  { %688 = vsyncpa [#allocation8 + $0x1], 1 }

</bundles_post_ra>
